<compile_context>
chip_gen: v5e
topology: v5e:2x2
jax: 0.10.0
libtpu: 0.0.40
codegen_flags: <defaults>
</compile_context>

<pallas_src>
import functools

import jax
import jax.numpy as jnp
from jax.experimental import pallas as pl
from jax.experimental.pallas import tpu as pltpu


def _ode_mlp_kernel(xT_ref, w1T_ref, b1_ref, w2T_ref, b2_ref, o_ref, *, compute_dtype):
    # xT_ref: (D, TN)   batch rides the 128-lane axis (lane-dense loads/stores)
    # w1T_ref: (H, D), b1_ref: (H, 1), w2T_ref: (D, H), b2_ref: (D, 1)
    xT = xT_ref[...]                                                  # (D, TN) f32

    # Layer 1 on the MXU (K = D is tiny, but the MXU extended slot is otherwise idle);
    # f32 accumulation, bias added in f32.
    s = jnp.dot(w1T_ref[...], xT, preferred_element_type=jnp.float32) + b1_ref[...]  # (H, TN)

    # tanh on the EUP.  bf16 on v6e/v7x roughly doubles transcendental throughput; the
    # plotting use case tolerates the precision.  Stays f32 on v5-class chips.
    h = jnp.tanh(s.astype(compute_dtype))                             # (H, TN)

    # Layer 2 on the MXU: lane-dense (D, TN) result, f32 accumulation, bias in f32.
    y = jnp.dot(w2T_ref[...].astype(compute_dtype), h,
                preferred_element_type=jnp.float32) + b2_ref[...]     # (D, TN)

    o_ref[...] = y.astype(o_ref.dtype)


def _default_compute_dtype():
    """bf16 tanh path on v6e/v7x, f32 on v5-class and anything unrecognized."""
    try:
        kind = jax.devices()[0].device_kind.lower()
    except Exception:  # pragma: no cover - no devices / weird backend
        return jnp.float32
    for old in ("v2", "v3", "v4", "v5"):
        if old in kind:
            return jnp.float32
    if ("v6" in kind) or ("v7" in kind) or ("7x" in kind):
        return jnp.bfloat16
    return jnp.float32


def ode_mlp_feature_major(xT, w1, b1, w2, b2, *, max_tile_n=8192, compute_dtype=None):
    """Feature-major entry point: xT is (D, N), returns (D, N).

    Large plotting grids should use this directly (keep the pipeline feature-major
    end-to-end) to avoid materializing transposes in HBM around every call.
    """
    d, n = xT.shape
    h_dim = w1.shape[1]
    if compute_dtype is None:
        compute_dtype = _default_compute_dtype()

    # Tiny parameter layout plumbing (negligible: a few KB).
    w1T = w1.T.astype(jnp.float32)                 # (H, D)
    w2T = w2.T.astype(jnp.float32)                 # (D, H)
    b1c = b1.reshape(h_dim, 1).astype(jnp.float32)
    b2c = b2.reshape(d, 1).astype(jnp.float32)

    # Tile choice: one big lane-dense tile per grid step.  8192 lanes amortizes the
    # ~0.35 us per-step overhead; small N collapses to a single step.
    if n <= max_tile_n:
        tile_n = max(128, pl.cdiv(n, 128) * 128)
    else:
        tile_n = max_tile_n
    grid = (pl.cdiv(n, tile_n),)                   # ragged final block, no jnp.pad

    # Deliberate VMEM budget: x/y blocks double-buffered + (H, tile_n) intermediates,
    # 4x headroom, capped at 32 MiB (safe on v7x's 64 MiB physical VMEM).
    block_bytes = d * tile_n * 4
    inter_bytes = h_dim * tile_n * 4
    vmem_limit = int(min(32 * 1024 * 1024,
                         max(8 * 1024 * 1024, 4 * (4 * block_bytes + 3 * inter_bytes))))

    kernel = functools.partial(_ode_mlp_kernel, compute_dtype=compute_dtype)

    yT = pl.pallas_call(
        kernel,
        out_shape=jax.ShapeDtypeStruct((d, n), xT.dtype),
        grid_spec=pl.GridSpec(
            grid=grid,
            in_specs=[
                pl.BlockSpec((d, tile_n), lambda i: (0, i)),      # xT tile (lane-dense)
                pl.BlockSpec((h_dim, d), lambda i: (0, 0)),       # W1^T  (VMEM-resident)
                pl.BlockSpec((h_dim, 1), lambda i: (0, 0)),       # b1
                pl.BlockSpec((d, h_dim), lambda i: (0, 0)),       # W2^T
                pl.BlockSpec((d, 1), lambda i: (0, 0)),           # b2
            ],
            out_specs=pl.BlockSpec((d, tile_n), lambda i: (0, i)),  # lane-dense output
        ),
        compiler_params=pltpu.CompilerParams(
            dimension_semantics=("parallel",),
            vmem_limit_bytes=vmem_limit,
        ),
    )(xT, w1T, b1c, w2T, b2c)

    return yT


def ode_wrapper_forward(x, w1, b1, w2, b2, *, max_tile_n=8192, compute_dtype=None):
    """Compatibility wrapper with torch semantics: x is (N, D), returns (N, D).

    NOTE: the two transposes here are separate XLA HBM passes; large plotting grids
    should call ode_mlp_feature_major directly and stay feature-major end-to-end.
    """
    yT = ode_mlp_feature_major(x.T, w1, b1, w2, b2,
                               max_tile_n=max_tile_n, compute_dtype=compute_dtype)
    return yT.T


def reference_forward(x, w1, b1, w2, b2):
    # plain-JAX reference of model(None, x)
    return jnp.tanh(x @ w1 + b1) @ w2 + b2


if __name__ == "__main__":
    key = jax.random.PRNGKey(0)
    k_x, k_w1, k_b1, k_w2, k_b2 = jax.random.split(key, 5)

    N, D, H = 128, 4, 32  # N grid points of a D-dim state, hidden width H

    x = jax.random.normal(k_x, (N, D), dtype=jnp.float32)
    # deterministic synthetic parameters (shapes per nn.Linear(D,H) / nn.Linear(H,D))
    w1 = jax.random.normal(k_w1, (D, H), dtype=jnp.float32) * 0.1
    b1 = jax.random.normal(k_b1, (H,), dtype=jnp.float32) * 0.1
    w2 = jax.random.normal(k_w2, (H, D), dtype=jnp.float32) * 0.1
    b2 = jax.random.normal(k_b2, (D,), dtype=jnp.float32) * 0.1

    compute_dtype = _default_compute_dtype()
    tol = 1e-5 if compute_dtype == jnp.float32 else 3e-2

    # 1) torch-semantics path, batch aligned to 128
    out = ode_wrapper_forward(x, w1, b1, w2, b2, compute_dtype=compute_dtype)
    out = jax.block_until_ready(out)
    ref = reference_forward(x, w1, b1, w2, b2)
    assert out.shape == (N, D)
    assert jnp.allclose(out, ref, atol=tol, rtol=tol), "mismatch vs reference (aligned N)"

    # 2) feature-major path with an unaligned batch (exercises the pad-free ragged block)
    N2 = 100
    x2 = jax.random.normal(jax.random.PRNGKey(1), (N2, D), dtype=jnp.float32)
    out2T = ode_mlp_feature_major(x2.T, w1, b1, w2, b2, compute_dtype=compute_dtype)
    out2T = jax.block_until_ready(out2T)
    ref2 = reference_forward(x2, w1, b1, w2, b2)
    assert out2T.shape == (D, N2)
    assert jnp.allclose(out2T.T, ref2, atol=tol, rtol=tol), "mismatch vs reference (ragged N)"

    print("KERNEL_OK")
</pallas_src>

<mosaic_0001>
module attributes {stable_mosaic.version = 11 : i64} {
  func.func @_ode_mlp_kernel(%arg0: i32, %arg1: memref<4x128xf32, #tpu.memory_space<vmem>>, %arg2: memref<32x4xf32, #tpu.memory_space<vmem>>, %arg3: memref<32x1xf32, #tpu.memory_space<vmem>>, %arg4: memref<4x32xf32, #tpu.memory_space<vmem>>, %arg5: memref<4x1xf32, #tpu.memory_space<vmem>>, %arg6: memref<4x128xf32, #tpu.memory_space<vmem>>) attributes {dimension_semantics = [#tpu.dimension_semantics<parallel>], iteration_bounds = array<i64: 1>, scalar_prefetch = 0 : i64, scratch_operands = 0 : i64, tpu.core_type = #tpu.core_type<tc>, window_params = [{transform_indices = @transform_0, window_bounds = array<i64: 4, 128>}, {pipeline_mode = #tpu.pipeline_mode<synchronous>, transform_indices = @transform_1, window_bounds = array<i64: 32, 4>}, {pipeline_mode = #tpu.pipeline_mode<synchronous>, transform_indices = @transform_2, window_bounds = array<i64: 32, 1>}, {pipeline_mode = #tpu.pipeline_mode<synchronous>, transform_indices = @transform_3, window_bounds = array<i64: 4, 32>}, {pipeline_mode = #tpu.pipeline_mode<synchronous>, transform_indices = @transform_4, window_bounds = array<i64: 4, 1>}, {transform_indices = @transform_5, window_bounds = array<i64: 4, 128>}]} {
    %c0 = arith.constant 0 : index
    %c0_0 = arith.constant 0 : index
    %0 = vector.load %arg1[%c0, %c0_0] : memref<4x128xf32, #tpu.memory_space<vmem>>, vector<4x128xf32>
    %c0_1 = arith.constant 0 : index
    %c0_2 = arith.constant 0 : index
    %1 = vector.load %arg2[%c0_1, %c0_2] : memref<32x4xf32, #tpu.memory_space<vmem>>, vector<32x4xf32>
    %cst = arith.constant dense<0.000000e+00> : vector<32x128xf32>
    %2 = tpu.matmul %1, %0, %cst {dimension_numbers = #tpu.dot_dimension_numbers<[1], [0], [0], [1], [0, 0, 1, 1], [], []>} : vector<32x4xf32>, vector<4x128xf32>, vector<32x128xf32> -> vector<32x128xf32>
    %c0_3 = arith.constant 0 : index
    %c0_4 = arith.constant 0 : index
    %3 = vector.load %arg3[%c0_3, %c0_4] : memref<32x1xf32, #tpu.memory_space<vmem>>, vector<32x1xf32>
    %4 = vector.broadcast %3 : vector<32x1xf32> to vector<32x128xf32>
    %5 = arith.addf %2, %4 : vector<32x128xf32>
    %6 = math.tanh %5 : vector<32x128xf32>
    %c0_5 = arith.constant 0 : index
    %c0_6 = arith.constant 0 : index
    %7 = vector.load %arg4[%c0_5, %c0_6] : memref<4x32xf32, #tpu.memory_space<vmem>>, vector<4x32xf32>
    %cst_7 = arith.constant dense<0.000000e+00> : vector<4x128xf32>
    %8 = tpu.matmul %7, %6, %cst_7 {dimension_numbers = #tpu.dot_dimension_numbers<[1], [0], [0], [1], [0, 0, 1, 1], [], []>} : vector<4x32xf32>, vector<32x128xf32>, vector<4x128xf32> -> vector<4x128xf32>
    %c0_8 = arith.constant 0 : index
    %c0_9 = arith.constant 0 : index
    %9 = vector.load %arg5[%c0_8, %c0_9] : memref<4x1xf32, #tpu.memory_space<vmem>>, vector<4x1xf32>
    %10 = vector.broadcast %9 : vector<4x1xf32> to vector<4x128xf32>
    %11 = arith.addf %8, %10 : vector<4x128xf32>
    %c0_10 = arith.constant 0 : index
    %c0_11 = arith.constant 0 : index
    %12 = vector.load %arg6[%c0_10, %c0_11] : memref<4x128xf32, #tpu.memory_space<vmem>>, vector<4x128xf32>
    tpu.vector_store %arg6[%c0_10, %c0_11], %11 {strides = array<i32>} : memref<4x128xf32, #tpu.memory_space<vmem>>, vector<4x128xf32>,
    return
  }
  func.func @transform_0(%arg0: i32) -> (i32, i32) {
    %c0_i32 = arith.constant 0 : i32
    %c0_i32_0 = arith.constant 0 : i32
    return %c0_i32, %arg0 : i32, i32
  }
  func.func @transform_1(%arg0: i32) -> (i32, i32) {
    %c0_i32 = arith.constant 0 : i32
    %c0_i32_0 = arith.constant 0 : i32
    %c0_i32_1 = arith.constant 0 : i32
    return %c0_i32, %c0_i32_0 : i32, i32
  }
  func.func @transform_2(%arg0: i32) -> (i32, i32) {
    %c0_i32 = arith.constant 0 : i32
    %c0_i32_0 = arith.constant 0 : i32
    %c0_i32_1 = arith.constant 0 : i32
    return %c0_i32, %c0_i32_0 : i32, i32
  }
  func.func @transform_3(%arg0: i32) -> (i32, i32) {
    %c0_i32 = arith.constant 0 : i32
    %c0_i32_0 = arith.constant 0 : i32
    %c0_i32_1 = arith.constant 0 : i32
    return %c0_i32, %c0_i32_0 : i32, i32
  }
  func.func @transform_4(%arg0: i32) -> (i32, i32) {
    %c0_i32 = arith.constant 0 : i32
    %c0_i32_0 = arith.constant 0 : i32
    %c0_i32_1 = arith.constant 0 : i32
    return %c0_i32, %c0_i32_0 : i32, i32
  }
  func.func @transform_5(%arg0: i32) -> (i32, i32) {
    %c0_i32 = arith.constant 0 : i32
    %c0_i32_0 = arith.constant 0 : i32
    return %c0_i32, %arg0 : i32, i32
  }
}

</mosaic_0001>

<bundles_post_ra>
// kernel: tpu_custom_call.1
= control target key start
LH: loop header
LB: loop body
LE: loop exit
PB: predicated region body
PF: predicated region fallthrough
CT: control target
= control target key end

     0   :  { %vm63_vm0 = vcmask 1043456   ;;  %vm50_vm1 = vcmask 31744   ;;  %v195_v5 = vmov 0   ;;  %s267_s0 = inlined_call_operand.vmem [shape: f32[4,128], index: 0, kind: input, shape index: {}]   ;;  %s268_s1 = inlined_call_operand.vmem [shape: f32[32,4], index: 1, kind: input, shape index: {}]   ;;  %s269_s2 = inlined_call_operand.vmem [shape: f32[32,1], index: 2, kind: input, shape index: {}]   ;;  %s270_s3 = inlined_call_operand.vmem [shape: f32[4,32], index: 3, kind: input, shape index: {}]   ;;  %s271_s4 = inlined_call_operand.vmem [shape: f32[4,1], index: 4, kind: input, shape index: {}]   ;;  %s272_s5 = inlined_call_operand.hbm [shape: f32[4,128], index: 5, kind: output, shape index: {}]  }
   0x1   :  { %v21_v0 = vld [vmem:[%s267_s0] sm:$0xf]  ;;  %v23_v1 = vld [vmem:[%s268_s1 + $0x8] sm:$0xff]  ;;  %v25_v2 = vld [vmem:[%s268_s1 + $0x18] sm:$0xff]  ;;  %158 = vset.pattern.permute.xlu0 %v195_v5 }
   0x2   :  { %154 = vmatpush.msk.msra.mxu2 %vm63_vm0, %v21_v0  ;;  %155 = vmatpush.msk.msra.mxu3 %vm63_vm0, %v21_v0  ;;  %v29_v3 = vld [vmem:[%s269_s2 + $0x18] sm:$0xff]  ;;  %v22_v4 = vld [vmem:[%s268_s1] sm:$0xff]  ;;  %v27_v6 = vld [vmem:[%s269_s2 + $0x8] sm:$0xff] }
   0x3   :  { %150 = vmatmul.msk.f32.vlgmr.msra.gmra.mxu2 %vm50_vm1, %v23_v1  ;;  %152 = vmatmul.msk.f32.vlgmr.msra.gmra.mxu3 %vm50_vm1, %v25_v2 }
   0x4   :  { %148 = vmatpush.msk.msra.mxu0 %vm63_vm0, %v21_v0 }
   0x5   :  { %10 = vsyncpa [#allocation3], 0  ;;  %47 = vperm.xlu0 %158, %v29_v3   ;;  %149 = vmatmul.msk.f32.vlgmr.msra.gmra.mxu0 %vm50_vm1, %v22_v4  ;;  %v24_v7 = vld [vmem:[%s268_s1 + $0x10] sm:$0xff]  ;;  %v26_v9 = vld [vmem:[%s269_s2] sm:$0xff]  ;;  %vm107_vm2 = vcmask 261120   ;;  %s139_s15 = sshll.u32 %s272_s5, 4  ;;  %s140_s15 = int_to_ptr.hbm [resolvable:$true] %s139_s15 }
   0x6   :  { %159 = vset.pattern.permute.xlu1 %v195_v5  ;;  %160 = vset.pattern.permute.xlu2 %v195_v5  ;;  %v28_v8 = vld [vmem:[%s269_s2 + $0x10] sm:$0xff]  ;;  %v101_v10 = vld [vmem:[%s271_s4] sm:$0xf]  ;;  %s196_s4 = smov [#allocation2]  }
   0x7   :  { %37 = vperm.xlu1 %159, %v27_v6   ;;  %104 = vperm.xlu2 %160, %v101_v10   ;;  %v100_v26 = vld [vmem:[%s270_s3] sm:$0xf]  ;;  %s137_s12 = sshll.u32 %s196_s4, 4  ;;  %s138_s12 = int_to_ptr.vmem [resolvable:$true] %s137_s12 }
   0xb   :  { %151 = vmatmul.msk.f32.gmra.mxu2 %vm50_vm1, %v24_v7 }
   0xd   :  { %42 = vperm.xlu0 %158, %v28_v8  }
   0xf   :  { %32 = vperm.xlu1 %159, %v26_v9  }
  0x61   :  { %v105_v28 = vpop.permute.xlu2 %104 }
  0x77   :  { %v48_v11 = vpop.permute.xlu0 %47 }
  0x79   :  { %v38_v12 = vpop.permute.xlu1 %37 }
  0x7f   :  { %v43_v16 = vpop.permute.xlu0 %42 }
  0x81   :  { %v33_v17 = vpop.permute.xlu1 %32 }
  0x82   :  { %v84_v18 = vpop.f32.mrf.mxu0 }
  0x83   :  { %v85_v23 = vadd.f32 %v84_v18, %v33_v17 }
  0x86   :  { %v87_v13 = vpop.f32.mrf.mxu2  ;;  %v93_v14 = vpop.f32.mrf.mxu3 }
  0x87   :  { %v94_v15 = vadd.f32 %v93_v14, %v48_v11  ;;  %v88_v20 = vadd.f32 %v87_v13, %v38_v12 }
  0x89   :  { %161 = vtanh.f32 %v94_v15 }
  0x8e   :  { %v90_v19 = vpop.f32.mrf.mxu2 }
  0x8f   :  { %v91_v21 = vadd.f32 %v90_v19, %v43_v16  ;;  %v162_v22 = vpop.eup %161 }
  0x90   :  { %123 = vmatpush.msra.mxu1 %v162_v22 }
  0x91   :  { %163 = vtanh.f32 %v91_v21 }
  0x92   :  { %165 = vtanh.f32 %v88_v20 }
  0x93   :  { %167 = vtanh.f32 %v85_v23 }
  0x97   :  { %v164_v24 = vpop.eup %163 }
  0x98   :  { %124 = vmatpush.msra.mxu1 %v164_v24  ;;  %v166_v25 = vpop.eup %165 }
  0x99   :  { %v168_v27 = vpop.eup %167 }
  0x9a   :  { %125 = vmatpush.msra.mxu1 %v166_v25 }
  0x9c   :  { %126 = vmatpush.msra.mxu1 %v168_v27 }
  0x9d   :  { %153 = vmatmul.msk.f32.vlgmr.msra.gmra.mxu1 %vm107_vm2, %v100_v26 }
 0x11a   :  { %v128_v29 = vpop.f32.mrf.mxu1 }
 0x11b   :  { %v129_v30 = vadd.f32 %v128_v29, %v105_v28 }
 0x11d   :  { %131 = vst [vmem:[#allocation2] sm:$0xf] %v129_v30 }
 0x11e   :  { %142 = dma.vmem_to_hbm [thread:$0]  %s138_s12, 64, %s140_s15, [#allocation3]  }
 0x11f   :  { %193 = dma.done.wait [#allocation3], 64  }
 0x120   :  { %194 = vsyncadd [#allocation3], 4294967232 }
 0x121   :  { %147 = vsyncpa [#allocation3], 1 }

</bundles_post_ra>
